<compile_context>
chip_gen: v7x
topology: tpu7x:2x2x1
jax: 0.10.0
libtpu: 0.0.40
codegen_flags: <defaults>
</compile_context>

<pallas_src>
import math

import jax
import jax.numpy as jnp
from jax.experimental import pallas as pl
from jax.experimental.pallas import tpu as pltpu

LANE = 128


def _round_up(x, m):
    return ((x + m - 1) // m) * m


def _physical_vmem_bytes():
    """Per-core VMEM capacity; conservative 64 MiB (v7x) fallback."""
    try:
        info = pltpu.get_tpu_info()
        v = getattr(info, "vmem_capacity_bytes", None)
        if v:
            return int(v)
    except Exception:
        pass
    return 64 << 20


def _vmem_estimate_bytes(tm, tk, d_model, itemsize):
    """Footprint of one pipelined step: double-buffered streams + intermediates + scratch."""
    per_step_streams = (
        tm * d_model * itemsize      # x tile
        + d_model * tk * itemsize    # W1 tile
        + tk * 4                     # b1 tile (f32)
        + tk * d_model * itemsize    # W2 tile
        + d_model * 4                # b2 (f32)
        + tm * d_model * itemsize    # out tile
        + tk * 4                     # neg-count partials
    )
    intermediates = tm * tk * 4 + tm * tk * itemsize   # h (f32) and r (weight dtype)
    scratch = tm * d_model * 4                         # f32 output accumulator
    return 2 * per_step_streams + intermediates + scratch


def _select_tiles(M, d_model_p, d_ff_p, itemsize, budget, tm_hi, row_align):
    tm_cands = sorted(
        {t for t in (1024, 512, 256, 128, 64, 32, 16, 8)
         if row_align <= t <= tm_hi and t % row_align == 0} | {tm_hi},
        reverse=True,
    )

    def fits(tm, tk):
        return _vmem_estimate_bytes(tm, tk, d_model_p, itemsize) <= budget

    def blocked_tk(tm):
        # Largest 256-aligned divisor of d_ff_p that fits (MXU is 2x256^2 on
        # v6e/v7x); 128-aligned fallback (fine on v5e's 4x128^2 MXU).
        for step in (256, 128):
            for tk in range(step * (d_ff_p // step), step - 1, -step):
                if d_ff_p % tk == 0 and fits(tm, tk):
                    return tk
        return None

    chosen = None
    # Pass 1: whole padded d_ff as one block (nk == 1) -> constant weight block
    # indices, so W1/W2 are DMA'd once for the entire kernel.
    resident_floor = min(256, tm_hi)
    for tm in tm_cands:
        if tm >= resident_floor and fits(tm, d_ff_p):
            chosen = (tm, d_ff_p)
            break
    # Pass 2: stream d_ff blocks; maximize tm (weight-streaming arithmetic
    # intensity ~ tm FLOPs per weight byte; v6e knee ~650 FLOPs/byte).
    if chosen is None:
        for tm in tm_cands:
            tk = blocked_tk(tm)
            if tk is not None:
                chosen = (tm, tk)
                break
    if chosen is None:  # pathological shapes: minimal tiles, correctness first
        chosen = (tm_cands[-1], min(d_ff_p, LANE))

    tm, tk = chosen
    # Prefer a row tile that divides M exactly (avoids a wrapper-side pad and
    # output slice = 2 extra HBM passes) if it is at least half the chosen tile.
    for t in tm_cands:
        if t <= tm and 2 * t >= tm and M % t == 0:
            if t == tm:
                break
            alt = d_ff_p if (tk == d_ff_p and fits(t, d_ff_p)) else blocked_tk(t)
            if alt is not None:
                return t, alt
            break
    return tm, tk


def _ffn_kernel(x_ref, w1_ref, b1_ref, w2_ref, b2_ref, out_ref, neg_ref, acc_ref):
    """Grid: (row_tiles [parallel], d_ff_tiles [arbitrary]).

    x_ref  : (tm, d_model_p)   input row tile
    w1_ref : (d_model_p, tk)   W1 column block
    b1_ref : (1, tk)           b1 block (f32)
    w2_ref : (tk, d_model_p)   W2 row block
    b2_ref : (1, d_model_p)    b2 (f32)
    out_ref: (tm, d_model_p)   output row tile (stored once, on the last k block)
    neg_ref: (1, 1, tk)        per-row-tile per-lane negative-count partials (f32)
    acc_ref: (tm, d_model_p)   f32 VMEM accumulator for the second matmul
    """
    k = pl.program_id(1)
    nk = pl.num_programs(1)

    @pl.when(k == 0)
    def _():
        acc_ref[...] = jnp.zeros_like(acc_ref)
        neg_ref[...] = jnp.zeros_like(neg_ref)

    # hidden block: x @ W1[:, kblk] + b1[kblk]   (MXU, f32 accumulation)
    h = jnp.dot(x_ref[...], w1_ref[...], preferred_element_type=jnp.float32)
    h = h + b1_ref[...]

    # Lane-dense per-lane negative counts; the cross-lane reduce is deferred to
    # the wrapper. No row mask: zero-padded rows give h == b1 and the wrapper
    # subtracts their exact contribution.
    neg_ref[...] += jnp.sum((h < 0.0).astype(jnp.float32), axis=0, keepdims=True)[None]

    # ReLU on the f32 accumulator, cast to the weight dtype for the MXU,
    # accumulate the second matmul into f32 scratch.
    r = jnp.maximum(h, 0.0).astype(w2_ref.dtype)
    acc_ref[...] += jnp.dot(r, w2_ref[...], preferred_element_type=jnp.float32)

    @pl.when(k == nk - 1)
    def _():
        out_ref[...] = (acc_ref[...] + b2_ref[...]).astype(out_ref.dtype)


def poswise_ffn(x, w1, b1, w2, b2, *, tm_max=1024, compute_dtype=None):
    """x: (B, S, d_model). Returns (output (B, S, d_model), ratio_neg scalar).

    Matches PoswiseFeedwardNet.forward: out = ReLU(x @ W1 + b1) @ W2 + b2,
    ratio_neg = mean(hidden < 0) over the original (unpadded) hidden tensor.
    """
    B, S, d_model = x.shape
    d_ff = w1.shape[1]
    M = B * S

    # TODO(synk): on v7x, fp8 weights would roughly double MXU rate again (no int path).
    if compute_dtype is not None:
        x = x.astype(compute_dtype)
        w1 = w1.astype(compute_dtype)
        w2 = w2.astype(compute_dtype)
    in_dtype = x.dtype
    itemsize = jnp.dtype(in_dtype).itemsize

    # Biases are added on the f32 accumulator inside the kernel.
    b1 = b1.reshape(1, d_ff).astype(jnp.float32)
    b2 = b2.reshape(1, d_model).astype(jnp.float32)

    # ---- lane-dense padding of d_model / d_ff (zero pads are inert) ----
    d_model_p = _round_up(d_model, LANE)
    d_ff_p = _round_up(d_ff, LANE)
    x2 = x.reshape(M, d_model)
    if d_model_p != d_model:
        x2 = jnp.pad(x2, ((0, 0), (0, d_model_p - d_model)))
        w1 = jnp.pad(w1, ((0, d_model_p - d_model), (0, 0)))
        w2 = jnp.pad(w2, ((0, 0), (0, d_model_p - d_model)))
        b2 = jnp.pad(b2, ((0, 0), (0, d_model_p - d_model)))
    if d_ff_p != d_ff:
        w1 = jnp.pad(w1, ((0, 0), (0, d_ff_p - d_ff)))
        w2 = jnp.pad(w2, ((0, d_ff_p - d_ff), (0, 0)))
        b1 = jnp.pad(b1, ((0, 0), (0, d_ff_p - d_ff)))

    # ---- generation-aware tiling from the real VMEM capacity ----
    vmem_phys = _physical_vmem_bytes()
    budget = int(0.80 * vmem_phys)
    row_align = 16 if in_dtype == jnp.bfloat16 else 8
    tm_max = max(row_align, (tm_max // row_align) * row_align)
    tm_hi = max(row_align, min(tm_max, _round_up(M, row_align)))
    tm, tk = _select_tiles(M, d_model_p, d_ff_p, itemsize, budget, tm_hi, row_align)

    if M % tm == 0:
        M_pad = M
    else:
        M_pad = _round_up(M, tm)
        x2 = jnp.pad(x2, ((0, M_pad - M), (0, 0)))
    n_rows = M_pad // tm
    nk = d_ff_p // tk

    est = _vmem_estimate_bytes(tm, tk, d_model_p, itemsize)
    vmem_limit = int(min(0.85 * vmem_phys, max(est + (4 << 20), 32 << 20)))

    # TODO(synk): for explicit dual-TensorCore sharding on v7x, switch the row axis to
    # pltpu.CORE_PARALLEL (or pl.core_map); plain "parallel" is kept for portability.
    # TODO(synk): if profiling shows exposed weight DMA on v5e/v6e when nk > 1, add
    # pipeline_mode=pl.Buffered(3) on the W1/W2 BlockSpecs (do NOT on v7x's 64 MiB).
    out_pad, neg_part = pl.pallas_call(
        _ffn_kernel,
        out_shape=(
            jax.ShapeDtypeStruct((M_pad, d_model_p), in_dtype),
            jax.ShapeDtypeStruct((n_rows, 1, tk), jnp.float32),
        ),
        grid_spec=pltpu.PrefetchScalarGridSpec(
            num_scalar_prefetch=0,
            grid=(n_rows, nk),
            in_specs=[
                pl.BlockSpec((tm, d_model_p), lambda i, k: (i, 0)),   # x rows
                pl.BlockSpec((d_model_p, tk), lambda i, k: (0, k)),   # W1 block
                pl.BlockSpec((1, tk), lambda i, k: (0, k)),           # b1 block
                pl.BlockSpec((tk, d_model_p), lambda i, k: (k, 0)),   # W2 block
                pl.BlockSpec((1, d_model_p), lambda i, k: (0, 0)),    # b2
            ],
            out_specs=[
                pl.BlockSpec((tm, d_model_p), lambda i, k: (i, 0)),   # output rows
                pl.BlockSpec((1, 1, tk), lambda i, k: (i, 0, 0)),     # neg partials
            ],
            scratch_shapes=[pltpu.VMEM((tm, d_model_p), jnp.float32)],
        ),
        compiler_params=pltpu.CompilerParams(
            # Row axis is race-free (per-row-tile neg partials / output tiles) ->
            # parallel; d_ff axis is a reduction -> arbitrary (inner).
            dimension_semantics=("parallel", "arbitrary"),
            vmem_limit_bytes=vmem_limit,
        ),
    )(x2, w1, b1, w2, b2)

    out = out_pad
    if M_pad != M:
        out = out[:M]
    if d_model_p != d_model:
        out = out[:, :d_model]
    out = out.reshape(B, S, d_model)

    # Exact integer reduce of the lane-dense partials (each partial <= tm*nk, exactly
    # representable in f32); int32 total covers counts up to ~2.1e9.
    neg_total = jnp.sum(neg_part.astype(jnp.int32))
    if M_pad != M:
        # Zero-padded rows produce hidden == b1 exactly; remove their contribution.
        neg_total = neg_total - (M_pad - M) * jnp.sum((b1 < 0.0).astype(jnp.int32))
    ratio_neg = neg_total.astype(jnp.float32) / jnp.float32(M * d_ff)
    return out, ratio_neg


def init_params(key, d_model, d_ff, dtype=jnp.float32):
    """Mimics nn.Linear default init (uniform(-1/sqrt(fan_in), 1/sqrt(fan_in)))."""
    k1, k2, k3, k4 = jax.random.split(key, 4)
    lim1 = 1.0 / math.sqrt(d_model)
    lim2 = 1.0 / math.sqrt(d_ff)
    # torch Linear weight is (out, in); stored transposed (in, out) so the kernel does x @ W.
    w1 = jax.random.uniform(k1, (d_model, d_ff), dtype, minval=-lim1, maxval=lim1)
    b1 = jax.random.uniform(k2, (1, d_ff), dtype, minval=-lim1, maxval=lim1)
    w2 = jax.random.uniform(k3, (d_ff, d_model), dtype, minval=-lim2, maxval=lim2)
    b2 = jax.random.uniform(k4, (1, d_model), dtype, minval=-lim2, maxval=lim2)
    return w1, b1, w2, b2


if __name__ == "__main__":
    # Small shapes consistent with a transformer FFN: (batch=2, seq=8, d_model=32), d_ff=64.
    B, S, d_model, d_ff = 2, 8, 32, 64
    key = jax.random.PRNGKey(0)
    kx, kp = jax.random.split(key)
    x = jax.random.normal(kx, (B, S, d_model), dtype=jnp.float32)
    w1, b1, w2, b2 = init_params(kp, d_model, d_ff)

    out, ratio_neg = poswise_ffn(x, w1, b1, w2, b2)
    out = jax.block_until_ready(out)
    ratio_neg = jax.block_until_ready(ratio_neg)

    # pure-JAX reference check (f32 path)
    h_ref = x.reshape(-1, d_model) @ w1 + b1.reshape(1, -1)
    ratio_ref = jnp.sum(h_ref < 0).astype(jnp.float32) / h_ref.size
    out_ref = (jnp.maximum(h_ref, 0.0) @ w2 + b2.reshape(1, -1)).reshape(B, S, d_model)
    assert jnp.allclose(out, out_ref, atol=1e-5, rtol=1e-5)
    assert jnp.allclose(ratio_neg, ratio_ref, atol=1e-6)

    # bf16 operands (f32 MXU accumulation in-kernel) — mixed-precision smoke test.
    out_bf, ratio_bf = poswise_ffn(x, w1, b1, w2, b2, compute_dtype=jnp.bfloat16)
    out_bf = jax.block_until_ready(out_bf)
    ratio_bf = jax.block_until_ready(ratio_bf)
    assert jnp.allclose(out_bf.astype(jnp.float32), out_ref, atol=1e-1, rtol=1e-1)
    assert bool(jnp.isfinite(ratio_bf))

    print("KERNEL_OK")
</pallas_src>

<mosaic_0001>
module attributes {stable_mosaic.version = 11 : i64} {
  func.func @_ffn_kernel(%arg0: i32, %arg1: i32, %arg2: memref<16x128xf32, #tpu.memory_space<vmem>>, %arg3: memref<128x128xf32, #tpu.memory_space<vmem>>, %arg4: memref<1x128xf32, #tpu.memory_space<vmem>>, %arg5: memref<128x128xf32, #tpu.memory_space<vmem>>, %arg6: memref<1x128xf32, #tpu.memory_space<vmem>>, %arg7: memref<16x128xf32, #tpu.memory_space<vmem>>, %arg8: memref<1x1x128xf32, #tpu.memory_space<vmem>>, %arg9: memref<16x128xf32, #tpu.memory_space<vmem>>) attributes {dimension_semantics = [#tpu.dimension_semantics<parallel>, #tpu.dimension_semantics<arbitrary>], iteration_bounds = array<i64: 1, 1>, scalar_prefetch = 0 : i64, scratch_operands = 1 : i64, tpu.core_type = #tpu.core_type<tc>, window_params = [{transform_indices = @transform_0, window_bounds = array<i64: 16, 128>}, {transform_indices = @transform_1, window_bounds = array<i64: 128, 128>}, {transform_indices = @transform_2, window_bounds = array<i64: 1, 128>}, {transform_indices = @transform_3, window_bounds = array<i64: 128, 128>}, {pipeline_mode = #tpu.pipeline_mode<synchronous>, transform_indices = @transform_4, window_bounds = array<i64: 1, 128>}, {transform_indices = @transform_5, window_bounds = array<i64: 16, 128>}, {transform_indices = @transform_6, window_bounds = array<i64: 1, 1, 128>}]} {
    %c0_i32 = arith.constant 0 : i32
    %0 = arith.cmpi eq, %arg1, %c0_i32 : i32
    %1 = arith.extui %0 : i1 to i32
    %c0_i32_0 = arith.constant 0 : i32
    %2 = arith.cmpi ne, %1, %c0_i32_0 : i32
    scf.if %2 {
      %cst_24 = arith.constant 0.000000e+00 : f32
      %29 = vector.broadcast %cst_24 : f32 to vector<16x128xf32>
      %c0_25 = arith.constant 0 : index
      %c0_26 = arith.constant 0 : index
      %30 = vector.load %arg9[%c0_25, %c0_26] : memref<16x128xf32, #tpu.memory_space<vmem>>, vector<16x128xf32>
      tpu.vector_store %arg9[%c0_25, %c0_26], %29 {strides = array<i32>} : memref<16x128xf32, #tpu.memory_space<vmem>>, vector<16x128xf32>,
      %cst_27 = arith.constant 0.000000e+00 : f32
      %31 = vector.broadcast %cst_27 : f32 to vector<1x1x128xf32>
      %c0_28 = arith.constant 0 : index
      %c0_29 = arith.constant 0 : index
      %c0_30 = arith.constant 0 : index
      %32 = vector.load %arg8[%c0_28, %c0_29, %c0_30] : memref<1x1x128xf32, #tpu.memory_space<vmem>>, vector<1x1x128xf32>
      tpu.vector_store %arg8[%c0_28, %c0_29, %c0_30], %31 {strides = array<i32>} : memref<1x1x128xf32, #tpu.memory_space<vmem>>, vector<1x1x128xf32>,
    } else {
    }
    %c0 = arith.constant 0 : index
    %c0_1 = arith.constant 0 : index
    %3 = vector.load %arg2[%c0, %c0_1] : memref<16x128xf32, #tpu.memory_space<vmem>>, vector<16x128xf32>
    %c0_2 = arith.constant 0 : index
    %c0_3 = arith.constant 0 : index
    %4 = vector.load %arg3[%c0_2, %c0_3] : memref<128x128xf32, #tpu.memory_space<vmem>>, vector<128x128xf32>
    %cst = arith.constant dense<0.000000e+00> : vector<16x128xf32>
    %5 = tpu.matmul %3, %4, %cst {dimension_numbers = #tpu.dot_dimension_numbers<[1], [0], [0], [1], [0, 0, 1, 1], [], []>} : vector<16x128xf32>, vector<128x128xf32>, vector<16x128xf32> -> vector<16x128xf32>
    %c0_4 = arith.constant 0 : index
    %c0_5 = arith.constant 0 : index
    %6 = vector.load %arg4[%c0_4, %c0_5] : memref<1x128xf32, #tpu.memory_space<vmem>>, vector<1x128xf32>
    %7 = vector.broadcast %6 : vector<1x128xf32> to vector<16x128xf32>
    %8 = arith.addf %5, %7 : vector<16x128xf32>
    %c0_6 = arith.constant 0 : index
    %c0_7 = arith.constant 0 : index
    %c0_8 = arith.constant 0 : index
    %9 = vector.load %arg8[%c0_6, %c0_7, %c0_8] : memref<1x1x128xf32, #tpu.memory_space<vmem>>, vector<1x1x128xf32>
    %cst_9 = arith.constant 0.000000e+00 : f32
    %10 = vector.broadcast %cst_9 : f32 to vector<16x128xf32>
    %11 = arith.cmpf olt, %8, %10 : vector<16x128xf32>
    %12 = arith.extui %11 : vector<16x128xi1> to vector<16x128xi32>
    %13 = arith.sitofp %12 : vector<16x128xi32> to vector<16x128xf32>
    %cst_10 = arith.constant dense<0.000000e+00> : vector<128xf32>
    %14 = vector.multi_reduction <add>, %13, %cst_10 [0] : vector<16x128xf32> to vector<128xf32>
    %15 = vector.shape_cast %14 : vector<128xf32> to vector<1x128xf32>
    %16 = vector.shape_cast %15 : vector<1x128xf32> to vector<1x1x128xf32>
    %17 = arith.addf %9, %16 : vector<1x1x128xf32>
    %c0_11 = arith.constant 0 : index
    %c0_12 = arith.constant 0 : index
    %c0_13 = arith.constant 0 : index
    %18 = vector.load %arg8[%c0_11, %c0_12, %c0_13] : memref<1x1x128xf32, #tpu.memory_space<vmem>>, vector<1x1x128xf32>
    tpu.vector_store %arg8[%c0_11, %c0_12, %c0_13], %17 {strides = array<i32>} : memref<1x1x128xf32, #tpu.memory_space<vmem>>, vector<1x1x128xf32>,
    %cst_14 = arith.constant 0.000000e+00 : f32
    %19 = vector.broadcast %cst_14 : f32 to vector<16x128xf32>
    %20 = arith.maximumf %8, %19 : vector<16x128xf32>
    %c0_15 = arith.constant 0 : index
    %c0_16 = arith.constant 0 : index
    %21 = vector.load %arg9[%c0_15, %c0_16] : memref<16x128xf32, #tpu.memory_space<vmem>>, vector<16x128xf32>
    %c0_17 = arith.constant 0 : index
    %c0_18 = arith.constant 0 : index
    %22 = vector.load %arg5[%c0_17, %c0_18] : memref<128x128xf32, #tpu.memory_space<vmem>>, vector<128x128xf32>
    %cst_19 = arith.constant dense<0.000000e+00> : vector<16x128xf32>
    %23 = tpu.matmul %20, %22, %cst_19 {dimension_numbers = #tpu.dot_dimension_numbers<[1], [0], [0], [1], [0, 0, 1, 1], [], []>} : vector<16x128xf32>, vector<128x128xf32>, vector<16x128xf32> -> vector<16x128xf32>
    %24 = arith.addf %21, %23 : vector<16x128xf32>
    %c0_20 = arith.constant 0 : index
    %c0_21 = arith.constant 0 : index
    %25 = vector.load %arg9[%c0_20, %c0_21] : memref<16x128xf32, #tpu.memory_space<vmem>>, vector<16x128xf32>
    tpu.vector_store %arg9[%c0_20, %c0_21], %24 {strides = array<i32>} : memref<16x128xf32, #tpu.memory_space<vmem>>, vector<16x128xf32>,
    %c0_i32_22 = arith.constant 0 : i32
    %26 = arith.cmpi eq, %arg1, %c0_i32_22 : i32
    %27 = arith.extui %26 : i1 to i32
    %c0_i32_23 = arith.constant 0 : i32
    %28 = arith.cmpi ne, %27, %c0_i32_23 : i32
    scf.if %28 {
      %c0_24 = arith.constant 0 : index
      %c0_25 = arith.constant 0 : index
      %29 = vector.load %arg9[%c0_24, %c0_25] : memref<16x128xf32, #tpu.memory_space<vmem>>, vector<16x128xf32>
      %c0_26 = arith.constant 0 : index
      %c0_27 = arith.constant 0 : index
      %30 = vector.load %arg6[%c0_26, %c0_27] : memref<1x128xf32, #tpu.memory_space<vmem>>, vector<1x128xf32>
      %31 = vector.broadcast %30 : vector<1x128xf32> to vector<16x128xf32>
      %32 = arith.addf %29, %31 : vector<16x128xf32>
      %c0_28 = arith.constant 0 : index
      %c0_29 = arith.constant 0 : index
      %33 = vector.load %arg7[%c0_28, %c0_29] : memref<16x128xf32, #tpu.memory_space<vmem>>, vector<16x128xf32>
      tpu.vector_store %arg7[%c0_28, %c0_29], %32 {strides = array<i32>} : memref<16x128xf32, #tpu.memory_space<vmem>>, vector<16x128xf32>,
    } else {
    }
    return
  }
  func.func @transform_0(%arg0: i32, %arg1: i32) -> (i32, i32) {
    %c0_i32 = arith.constant 0 : i32
    %c0_i32_0 = arith.constant 0 : i32
    return %arg0, %c0_i32 : i32, i32
  }
  func.func @transform_1(%arg0: i32, %arg1: i32) -> (i32, i32) {
    %c0_i32 = arith.constant 0 : i32
    %c0_i32_0 = arith.constant 0 : i32
    return %c0_i32, %arg1 : i32, i32
  }
  func.func @transform_2(%arg0: i32, %arg1: i32) -> (i32, i32) {
    %c0_i32 = arith.constant 0 : i32
    %c0_i32_0 = arith.constant 0 : i32
    return %c0_i32, %arg1 : i32, i32
  }
  func.func @transform_3(%arg0: i32, %arg1: i32) -> (i32, i32) {
    %c0_i32 = arith.constant 0 : i32
    %c0_i32_0 = arith.constant 0 : i32
    return %arg1, %c0_i32 : i32, i32
  }
  func.func @transform_4(%arg0: i32, %arg1: i32) -> (i32, i32) {
    %c0_i32 = arith.constant 0 : i32
    %c0_i32_0 = arith.constant 0 : i32
    %c0_i32_1 = arith.constant 0 : i32
    return %c0_i32, %c0_i32_0 : i32, i32
  }
  func.func @transform_5(%arg0: i32, %arg1: i32) -> (i32, i32) {
    %c0_i32 = arith.constant 0 : i32
    %c0_i32_0 = arith.constant 0 : i32
    return %arg0, %c0_i32 : i32, i32
  }
  func.func @transform_6(%arg0: i32, %arg1: i32) -> (i32, i32, i32) {
    %c0_i32 = arith.constant 0 : i32
    %c0_i32_0 = arith.constant 0 : i32
    %c0_i32_1 = arith.constant 0 : i32
    return %arg0, %c0_i32, %c0_i32_0 : i32, i32, i32
  }
}

</mosaic_0001>

<bundles_post_ra>
// kernel: tpu_custom_call.1
= control target key start
LH: loop header
LB: loop body
LE: loop exit
PB: predicated region body
PF: predicated region fallthrough
CT: control target
= control target key end

     0   :  { %12 = vsyncpa [#allocation4], 0  ;;  %s766_s0 = inlined_call_operand.hbm [shape: f32[16,128], index: 0, kind: input, shape index: {}]   ;;  %s767_s1 = inlined_call_operand.hbm [shape: f32[128,128], index: 1, kind: input, shape index: {}]   ;;  %s768_s2 = inlined_call_operand.vmem [shape: f32[1,128], index: 2, kind: input, shape index: {}]   ;;  %s769_s3 = inlined_call_operand.hbm [shape: f32[128,128], index: 3, kind: input, shape index: {}]   ;;  %s770_s4 = inlined_call_operand.vmem [shape: f32[1,128], index: 4, kind: input, shape index: {}]   ;;  %s771_s5 = inlined_call_operand.hbm [shape: f32[16,128], index: 5, kind: output, shape index: {0}]   ;;  %s772_s6 = inlined_call_operand.hbm [shape: f32[1,1,128], index: 6, kind: output, shape index: {1}]  }
   0x1   :  { %13 = vsyncpa [#allocation7], 0 }
   0x2   :  { %14 = vsyncpa [#allocation5], 0 }
   0x3   :  { %15 = vsyncpa [#allocation11], 0  ;;  %s635_s21 = smov [#allocation6]   ;;  %s636_s23 = smov [#allocation3]  }
   0x4   :  { %s33_s22 = sshll.u32 %s635_s21, 4  ;;  %s21_s24 = sshll.u32 %s636_s23, 4  ;;  %s34_s22 = int_to_ptr.vmem [resolvable:$true] %s33_s22  ;;  %s678_s24 = int_to_ptr.vmem [resolvable:$true] %s21_s24 }
   0x5   :  { %s517_s27 = scalar_lea.hbm %s767_s1, 2048 }
   0x6   :  { %p518_p0 = scmp.ne.s32.totalorder %s767_s1, %s517_s27  ;;  %p521_p1 = scmp.lt.u32.totalorder %s517_s27, %s767_s1 }
   0x8   :  { %p523_p2 = pnand %p521_p1, %p518_p0 }
   0xa   :  { %526 = shalt.err (!%p523_p2)
}
   0xb   :  { %s527_s8 = scalar_lea.vmem %s34_s22, 2048  ;;  %p532_p4 = scmp.lt.s32.totalorder %s34_s22, %s34_s22 }
   0xc   :  { %p528_p3 = scmp.ne.s32.totalorder %s34_s22, %s527_s8  ;;  %p533_p5 = scmp.lt.s32.totalorder %s527_s8, %s527_s8 }
   0xe   :  { %p534_p6 = por %p533_p5, %p532_p4 }
  0x10   :  { %p535_p7 = pnand %p534_p6, %p528_p3 }
  0x12   :  { %538 = shalt.err (!%p535_p7)
}
  0x13   :  { %s637_s9 = smov 128   ;;  %s638_s10 = smov 8  }
  0x14   :  { %39 = dma.hbm_to_vmem [thread:$0]  %s767_s1, 2048, %s34_s22, [#allocation7], %s637_s9, %s637_s9, %s638_s10  }
  0x15   :  { %s539_s15 = scalar_lea.hbm %s766_s0, 256 }
  0x16   :  { %p540_p8 = scmp.ne.s32.totalorder %s766_s0, %s539_s15  ;;  %p543_p9 = scmp.lt.u32.totalorder %s539_s15, %s766_s0 }
  0x18   :  { %p545_p10 = pnand %p543_p9, %p540_p8 }
  0x1a   :  { %548 = shalt.err (!%p545_p10)
}
  0x1b   :  { %s549_s20 = scalar_lea.vmem %s678_s24, 256  ;;  %p554_p12 = scmp.lt.s32.totalorder %s678_s24, %s678_s24 }
  0x1c   :  { %p550_p11 = scmp.ne.s32.totalorder %s678_s24, %s549_s20  ;;  %p555_p13 = scmp.lt.s32.totalorder %s549_s20, %s549_s20 }
  0x1e   :  { %p556_p0 = por %p555_p13, %p554_p12 }
  0x20   :  { %p557_p1 = pnand %p556_p0, %p550_p11 }
  0x22   :  { %560 = shalt.err (!%p557_p1)
}
  0x23   :  { %27 = dma.hbm_to_vmem [thread:$0]  %s766_s0, 256, %s678_s24, [#allocation4], %s637_s9, %s637_s9, %s638_s10  }
  0x24   :  { %s639_s22 = smov [#allocation8]   ;;  %s561_s27 = scalar_lea.hbm %s769_s3, 2048 }
  0x25   :  { %s47_s23 = sshll.u32 %s639_s22, 4  ;;  %p562_p2 = scmp.ne.s32.totalorder %s769_s3, %s561_s27  ;;  %s48_s23 = int_to_ptr.vmem [resolvable:$true] %s47_s23 }
  0x26   :  { %p565_p3 = scmp.lt.u32.totalorder %s561_s27, %s769_s3 }
  0x28   :  { %p567_p4 = pnand %p565_p3, %p562_p2 }
  0x2a   :  { %570 = shalt.err (!%p567_p4)
}
  0x2b   :  { %s571_s8 = scalar_lea.vmem %s48_s23, 2048  ;;  %p576_p6 = scmp.lt.s32.totalorder %s48_s23, %s48_s23 }
  0x2c   :  { %p572_p5 = scmp.ne.s32.totalorder %s48_s23, %s571_s8  ;;  %p577_p7 = scmp.lt.s32.totalorder %s571_s8, %s571_s8 }
  0x2e   :  { %p578_p8 = por %p577_p7, %p576_p6 }
  0x30   :  { %p579_p9 = pnand %p578_p8, %p572_p5 }
  0x32   :  { %582 = shalt.err (!%p579_p9)
}
  0x33   :  { %53 = dma.hbm_to_vmem [thread:$0]  %s769_s3, 2048, %s48_s23, [#allocation7], %s637_s9, %s637_s9, %s638_s10  }
  0x34   :  { %627 = dma.done.wait [#allocation4], 256  }
  0x35   :  { %628 = vsyncadd [#allocation4], 4294967040 }
  0x36   :  { %629 = dma.done.wait [#allocation7], 4096  }
  0x37   :  { %630 = vsyncadd [#allocation7], 4294963200  ;;  %v640_v0 = vmov 0.0   ;;  %v74_v1 = vld [vmem:[#allocation6] sm:$0xff]  ;;  %v75_v2 = vld [vmem:[#allocation6 + $0x8] sm:$0xff] }
  0x38   :  { %71 = vst [vmem:[#allocation10] sm:$0x1] %v640_v0  ;;  %v76_v3 = vld [vmem:[#allocation6 + $0x10] sm:$0xff]  ;;  %v445_v4 = vpack.c.bf16 %v75_v2, %v74_v1  ;;  %v77_v5 = vld [vmem:[#allocation6 + $0x18] sm:$0xff]  ;;  %v78_v7 = vld [vmem:[#allocation6 + $0x20] sm:$0xff] }
  0x39   :  { %v449_v6 = vpack.c.bf16 %v77_v5, %v76_v3  ;;  %v79_v8 = vld [vmem:[#allocation6 + $0x28] sm:$0xff]  ;;  %v80_v10 = vld [vmem:[#allocation6 + $0x30] sm:$0xff]  ;;  %v81_v11 = vld [vmem:[#allocation6 + $0x38] sm:$0xff] }
  0x3a   :  { %446 = vmatprep.subr.bf16.mxu0 %v445_v4  ;;  %v453_v9 = vpack.c.bf16 %v79_v8, %v78_v7  ;;  %v72_v12 = vld [vmem:[#allocation3] sm:$0xff]  ;;  %v192_v13 = vld [vmem:[#allocation8] sm:$0xff]  ;;  %v193_v14 = vld [vmem:[#allocation8 + $0x8] sm:$0xff]  ;;  %v457_v21 = vpack.c.bf16 %v81_v11, %v80_v10 }
  0x3b   :  { %448 = vmatpush3.bf16.msra.mxu0 %v445_v4  ;;  %407 = vmatprep.mubr.f32.mxu0 %v72_v12  ;;  %v194_v15 = vld [vmem:[#allocation8 + $0x10] sm:$0xff]  ;;  %v477_v16 = vpack.c.bf16 %v193_v14, %v192_v13  ;;  %v195_v17 = vld [vmem:[#allocation8 + $0x18] sm:$0xff]  ;;  %v196_v19 = vld [vmem:[#allocation8 + $0x20] sm:$0xff] }
  0x3c   :  { %450 = vmatprep.subr.bf16.mxu0 %v449_v6  ;;  %v481_v18 = vpack.c.bf16 %v195_v17, %v194_v15  ;;  %v197_v20 = vld [vmem:[#allocation8 + $0x28] sm:$0xff]  ;;  %v82_v22 = vld [vmem:[#allocation6 + $0x40] sm:$0xff]  ;;  %v198_v25 = vld [vmem:[#allocation8 + $0x30] sm:$0xff] }
  0x3d   :  { %478 = vmatprep.subr.bf16.mxu1 %v477_v16  ;;  %v83_v23 = vld [vmem:[#allocation6 + $0x48] sm:$0xff]  ;;  %v485_v24 = vpack.c.bf16 %v197_v20, %v196_v19  ;;  %v199_v26 = vld [vmem:[#allocation8 + $0x38] sm:$0xff]  ;;  %v84_v28 = vld [vmem:[#allocation6 + $0x50] sm:$0xff] }
  0x3e   :  { %480 = vmatpush3.bf16.msra.mxu1 %v477_v16  ;;  %v461_v27 = vpack.c.bf16 %v83_v23, %v82_v22  ;;  %v85_v29 = vld [vmem:[#allocation6 + $0x58] sm:$0xff]  ;;  %v489_v30 = vpack.c.bf16 %v199_v26, %v198_v25  ;;  %v200_v31 = vld [vmem:[#allocation8 + $0x40] sm:$0xff]  ;;  %v201_v32 = vld [vmem:[#allocation8 + $0x48] sm:$0xff] }
  0x3f   :  { %452 = vmatpush3.bf16.msra.mxu0 %v449_v6  ;;  %482 = vmatprep.subr.bf16.mxu1 %v481_v18  ;;  %v465_v33 = vpack.c.bf16 %v85_v29, %v84_v28  ;;  %v86_v34 = vld [vmem:[#allocation6 + $0x60] sm:$0xff]  ;;  %v87_v35 = vld [vmem:[#allocation6 + $0x68] sm:$0xff]  ;;  %v493_v36 = vpack.c.bf16 %v201_v32, %v200_v31  ;;  %v202_v37 = vld [vmem:[#allocation8 + $0x50] sm:$0xff] }
  0x40   :  { %454 = vmatprep.subr.bf16.mxu0 %v453_v9  ;;  %v203_v38 = vld [vmem:[#allocation8 + $0x58] sm:$0xff]  ;;  %v469_v39 = vpack.c.bf16 %v87_v35, %v86_v34  ;;  %v88_v40 = vld [vmem:[#allocation6 + $0x70] sm:$0xff]  ;;  %v204_v43 = vld [vmem:[#allocation8 + $0x60] sm:$0xff] }
  0x41   :  { %v89_v41 = vld [vmem:[#allocation6 + $0x78] sm:$0xff]  ;;  %v497_v42 = vpack.c.bf16 %v203_v38, %v202_v37  ;;  %v205_v44 = vld [vmem:[#allocation8 + $0x68] sm:$0xff]  ;;  %v206_v48 = vld [vmem:[#allocation8 + $0x70] sm:$0xff] }
  0x42   :  { %484 = vmatpush3.bf16.msra.mxu1 %v481_v18  ;;  %v473_v45 = vpack.c.bf16 %v89_v41, %v88_v40  ;;  %v501_v46 = vpack.c.bf16 %v205_v44, %v204_v43  ;;  %v73_v47 = vld [vmem:[#allocation3 + $0x8] sm:$0xff]  ;;  %v335_v51 = vld [vmem:[%s768_s2] ss:$0 sm:$0xff]  ;;  %s641_s2 = smov [#allocation10]  }
  0x43   :  { %456 = vmatpush3.bf16.msra.mxu0 %v453_v9  ;;  %486 = vmatprep.subr.bf16.mxu1 %v485_v24  ;;  %v207_v49 = vld [vmem:[#allocation8 + $0x78] sm:$0xff]  ;;  %v172_v3 = vld [vmem:[#allocation10] sm:$0x1]  ;;  %s321_s12 = sshll.u32 %s641_s2, 4  ;;  %s322_s12 = int_to_ptr.vmem [resolvable:$true] %s321_s12 }
  0x44   :  { %458 = vmatprep.subr.bf16.mxu0 %v457_v21  ;;  %v505_v50 = vpack.c.bf16 %v207_v49, %v206_v48  ;;  %s583_s13 = scalar_lea.vmem %s322_s12, 16  ;;  %s587_s14 = scalar_lea.vmem %s322_s12, 32 }
  0x45   :  { %p584_p10 = scmp.ne.s32.totalorder %s322_s12, %s583_s13  ;;  %p588_p11 = scmp.lt.s32.totalorder %s322_s12, %s322_s12 }
  0x46   :  { %488 = vmatpush3.bf16.msra.mxu1 %v485_v24  ;;  %p589_p12 = scmp.lt.s32.totalorder %s587_s14, %s583_s13 }
  0x47   :  { %460 = vmatpush3.bf16.msra.mxu0 %v457_v21  ;;  %490 = vmatprep.subr.bf16.mxu1 %v489_v30 }
  0x48   :  { %462 = vmatprep.subr.bf16.mxu0 %v461_v27  ;;  %p590_p13 = por %p589_p12, %p588_p11 }
  0x4a   :  { %492 = vmatpush3.bf16.msra.mxu1 %v489_v30  ;;  %p591_p0 = pnand %p590_p13, %p584_p10 }
  0x4b   :  { %464 = vmatpush3.bf16.msra.mxu0 %v461_v27  ;;  %494 = vmatprep.subr.bf16.mxu1 %v493_v36 }
  0x4c   :  { %466 = vmatprep.subr.bf16.mxu0 %v465_v33 }
  0x4e   :  { %496 = vmatpush3.bf16.msra.mxu1 %v493_v36 }
  0x4f   :  { %468 = vmatpush3.bf16.msra.mxu0 %v465_v33  ;;  %498 = vmatprep.subr.bf16.mxu1 %v497_v42 }
  0x50   :  { %470 = vmatprep.subr.bf16.mxu0 %v469_v39 }
  0x52   :  { %500 = vmatpush3.bf16.msra.mxu1 %v497_v42 }
  0x53   :  { %472 = vmatpush3.bf16.msra.mxu0 %v469_v39  ;;  %502 = vmatprep.subr.bf16.mxu1 %v501_v46 }
  0x54   :  { %474 = vmatprep.subr.bf16.mxu0 %v473_v45 }
  0x56   :  { %504 = vmatpush3.bf16.msra.mxu1 %v501_v46 }
  0x57   :  { %476 = vmatpush3.bf16.msra.mxu0 %v473_v45  ;;  %506 = vmatprep.subr.bf16.mxu1 %v505_v50 }
  0x5a   :  { %408 = vmatmul.mubr.f32.vlgmr.msra.gmra.mrb[0].mxu0 %v73_v47  ;;  %508 = vmatpush3.bf16.msra.mxu1 %v505_v50 }
 0x12d   :  { %v409_v52 = vpop.f32.mrb[0].mxu0 }
 0x12e   :  { %v169_v53 = vadd.f32 %v409_v52, %v335_v51  ;;  %v163_v54 = vpop.f32.mrb[1].mxu0 }
 0x12f   :  { %v164_v55 = vadd.f32 %v335_v51, %v163_v54 }
 0x130   :  { %vm174_vm0 = vcmp.lt.f32.partialorder %v169_v53, 0.0  ;;  %v189_v58 = vmax.f32 %v169_v53, 0.0 }
 0x131   :  { %v337_v56 = vsel %vm174_vm0, 1.0, %v640_v0  ;;  %vm173_vm1 = vcmp.lt.f32.partialorder %v164_v55, 0.0  ;;  %v188_v57 = vmax.f32 %v164_v55, 0.0 }
 0x132   :  { %v336_v59 = vsel %vm173_vm1, 1.0, %v640_v0 }
 0x133   :  { %v179_v60 = vadd.f32 %v337_v56, %v336_v59  ;;  %442 = vmatprep.mubr.f32.mxu1 %v188_v57 }
 0x134   :  { %443 = vmatmul.mubr.f32.vlgmr.msra.gmra.mrb[0].mxu1 %v189_v58 }
 0x135   :  { %v180_v61 = vrot.slane %v179_v60, 4 }
 0x137   :  { %v181_v62 = vadd.f32 %v180_v61, %v179_v60 }
 0x139   :  { %v182_v63 = vrot.slane %v181_v62, 2 }
 0x13b   :  { %v183_v1 = vadd.f32 %v182_v63, %v181_v62 }
 0x13d   :  { %v184_v2 = vrot.slane %v183_v1, 1 }
 0x13f   :  { %v185_v4 = vadd.f32 %v184_v2, %v183_v1 }
 0x141   :  { %v186_v5 = vadd.f32 %v185_v4, %v172_v3 }
 0x143   :  { %187 = vst [vmem:[#allocation10] sm:$0x1] %v186_v5 }
 0x144   :  { %594 = shalt.err (!%p591_p0)
}
 0x145   :  { %s595_s17 = scalar_lea.hbm %s772_s6, 16 }
 0x146   :  { %p596_p1 = scmp.ne.s32.totalorder %s772_s6, %s595_s17  ;;  %p599_p2 = scmp.lt.u32.totalorder %s595_s17, %s772_s6 }
 0x148   :  { %p601_p3 = pnand %p599_p2, %p596_p1 }
 0x14a   :  { %604 = shalt.err (!%p601_p3)
}
 0x14b   :  { %324 = dma.vmem_to_hbm [thread:$0]  %s322_s12, 16, %s772_s6, [#allocation11]   ;;  %v338_v0 = vld [vmem:[%s770_s4] ss:$0 sm:$0xff] }
 0x14c   :  { %s642_s26 = smov [#allocation9]  }
 0x14d   :  { %s308_s27 = sshll.u32 %s642_s26, 4  ;;  %s309_s27 = int_to_ptr.vmem [resolvable:$true] %s308_s27 }
 0x14e   :  { %s605_s28 = scalar_lea.vmem %s309_s27, 256  ;;  %p610_p5 = scmp.lt.s32.totalorder %s309_s27, %s309_s27 }
 0x14f   :  { %p606_p4 = scmp.ne.s32.totalorder %s309_s27, %s605_s28  ;;  %p611_p6 = scmp.lt.s32.totalorder %s605_s28, %s605_s28 }
 0x151   :  { %p612_p7 = por %p611_p6, %p610_p5 }
 0x153   :  { %p613_p8 = pnand %p612_p7, %p606_p4 }
 0x207   :  { %v444_v6 = vpop.f32.mrb[0].mxu1 }
 0x208   :  { %v300_v7 = vadd.f32 %v444_v6, %v338_v0  ;;  %v274_v8 = vpop.f32.mrb[1].mxu1 }
 0x209   :  { %v299_v9 = vadd.f32 %v338_v0, %v274_v8 }
 0x20a   :  { %302 = vst [vmem:[#allocation9 + $0x8] sm:$0xff] %v300_v7 }
 0x20b   :  { %301 = vst [vmem:[#allocation9] sm:$0xff] %v299_v9 }
 0x20c   :  { %616 = shalt.err (!%p613_p8)
}
 0x20d   :  { %s617_s4 = scalar_lea.hbm %s771_s5, 256 }
 0x20e   :  { %p618_p9 = scmp.ne.s32.totalorder %s771_s5, %s617_s4  ;;  %p621_p10 = scmp.lt.u32.totalorder %s617_s4, %s771_s5 }
 0x210   :  { %p623_p11 = pnand %p621_p10, %p618_p9 }
 0x212   :  { %626 = shalt.err (!%p623_p11)
}
 0x213   :  { %314 = dma.vmem_to_hbm [thread:$0]  %s309_s27, 256, %s771_s5, [#allocation5], %s637_s9, %s637_s9, %s638_s10  }
 0x214   :  { %631 = dma.done.wait [#allocation5], 256  }
 0x215   :  { %632 = vsyncadd [#allocation5], 4294967040 }
 0x216   :  { %633 = dma.done.wait [#allocation11], 16  }
 0x217   :  { %634 = vsyncadd [#allocation11], 4294967280 }
 0x218   :  { %331 = vsyncpa [#allocation4], 1 }
 0x219   :  { %332 = vsyncpa [#allocation7], 1 }
 0x21a   :  { %333 = vsyncpa [#allocation5], 1 }
 0x21b   :  { %334 = vsyncpa [#allocation11], 1 }

</bundles_post_ra>
